<compile_context>
chip_gen: v6e
topology: v6e:2x2x1
jax: 0.10.0
libtpu: 0.0.40
codegen_flags: <defaults>
</compile_context>

<pallas_src>
import functools

import jax
import jax.numpy as jnp
from jax.experimental import pallas as pl
from jax.experimental.pallas import tpu as pltpu


TB = 128          # batch rows per grid step (multiple of 8, matches MXU rows)
N_OUT_PAD = 128   # lane-dense padded output width


def _mlp_kernel(x_ref,
                w1_ref, b1_ref,
                w2_ref, b2_ref,
                w3_ref, b3_ref,
                w4_ref, b4_ref,
                o_ref):
    """Fused 4-layer MLP (Linear+ReLU x3, Linear) for one batch tile.

    Matmul inputs are bf16 (MXU-native), accumulation is f32; bias add and
    ReLU are done in f32 on the VPU.
    """
    x = x_ref[...]  # bf16 (TB, n_obs)

    h = jnp.dot(x, w1_ref[...], preferred_element_type=jnp.float32) + b1_ref[...]
    h = jnp.maximum(h, 0.0)

    h = jnp.dot(h.astype(jnp.bfloat16), w2_ref[...],
                preferred_element_type=jnp.float32) + b2_ref[...]
    h = jnp.maximum(h, 0.0)

    h = jnp.dot(h.astype(jnp.bfloat16), w3_ref[...],
                preferred_element_type=jnp.float32) + b3_ref[...]
    h = jnp.maximum(h, 0.0)

    out = jnp.dot(h.astype(jnp.bfloat16), w4_ref[...],
                  preferred_element_type=jnp.float32) + b4_ref[...]
    o_ref[...] = out.astype(o_ref.dtype)


def prepare_params(params):
    """One-time prep: cast weights to bf16, keep biases f32, pad layer4 to
    a lane-dense (., 128) output width. Do this once and reuse across calls
    so the cast/pad cost is amortized (the kernel is launch/DMA-bound at
    small batch)."""
    n_actions = params["w4"].shape[1]
    prepared = {
        "w1": params["w1"].astype(jnp.bfloat16),
        "b1": params["b1"].astype(jnp.float32),
        "w2": params["w2"].astype(jnp.bfloat16),
        "b2": params["b2"].astype(jnp.float32),
        "w3": params["w3"].astype(jnp.bfloat16),
        "b3": params["b3"].astype(jnp.float32),
        "w4": jnp.zeros((params["w4"].shape[0], N_OUT_PAD), jnp.bfloat16)
               .at[:, :n_actions].set(params["w4"].astype(jnp.bfloat16)),
        "b4": jnp.zeros((1, N_OUT_PAD), jnp.float32)
               .at[:, :n_actions].set(params["b4"].astype(jnp.float32)),
    }
    return prepared, n_actions


@functools.partial(jax.jit, static_argnames=("n_actions",))
def block_forward(x, prepared, *, n_actions):
    """Run the BLOCK MLP forward pass with a single fused Pallas kernel.

    x:        (B, n_observations) float32 (or bf16)
    prepared: dict from prepare_params (bf16 weights, f32 biases, layer4
              padded to N_OUT_PAD lanes).
    """
    B, n_obs = x.shape

    # Pad batch to a multiple of the batch tile so every vmatmul / vst sees a
    # full (TB, .) tile (B=2 would otherwise fill 2 of 8 sublanes).
    b_pad = pl.cdiv(B, TB) * TB
    x_p = jnp.zeros((b_pad, n_obs), jnp.bfloat16).at[:B].set(x.astype(jnp.bfloat16))

    grid = (b_pad // TB,)

    # Batch-indexed activation tiles; weights/biases use constant block
    # indices so they stay VMEM-resident across grid steps (no re-DMA).
    x_spec = pl.BlockSpec((TB, n_obs), lambda i: (i, 0))
    const = lambda shape: pl.BlockSpec(shape, lambda i: (0, 0))
    out_spec = pl.BlockSpec((TB, N_OUT_PAD), lambda i: (i, 0))

    in_specs = [
        x_spec,
        const(prepared["w1"].shape), const(prepared["b1"].shape),
        const(prepared["w2"].shape), const(prepared["b2"].shape),
        const(prepared["w3"].shape), const(prepared["b3"].shape),
        const(prepared["w4"].shape), const(prepared["b4"].shape),
    ]

    out_padded = pl.pallas_call(
        _mlp_kernel,
        out_shape=jax.ShapeDtypeStruct((b_pad, N_OUT_PAD), jnp.float32),
        grid=grid,
        in_specs=in_specs,
        out_specs=out_spec,
        compiler_params=pltpu.CompilerParams(
            dimension_semantics=("parallel",)),  # v7x: split batch tiles over TCs
    )(x_p,
      prepared["w1"], prepared["b1"],
      prepared["w2"], prepared["b2"],
      prepared["w3"], prepared["b3"],
      prepared["w4"], prepared["b4"])

    return out_padded[:B, :n_actions]


def init_params(key, n_observations, n_actions):
    """Deterministic parameter init matching nn.Linear shapes.

    PyTorch nn.Linear(in, out) stores weight as (out, in); we store the
    transpose (in, out) so the kernel can do x @ W directly.
    """
    dims = [(n_observations, 128), (128, 256), (256, 128), (128, n_actions)]
    params = {}
    for i, (fan_in, fan_out) in enumerate(dims, start=1):
        key, kw, kb = jax.random.split(key, 3)
        bound = 1.0 / jnp.sqrt(fan_in)  # PyTorch default U(-1/sqrt(in), 1/sqrt(in))
        params[f"w{i}"] = jax.random.uniform(
            kw, (fan_in, fan_out), jnp.float32, -bound, bound)
        params[f"b{i}"] = jax.random.uniform(
            kb, (1, fan_out), jnp.float32, -bound, bound)
    return params


def reference_forward(x, params):
    h = jnp.maximum(x @ params["w1"] + params["b1"], 0.0)
    h = jnp.maximum(h @ params["w2"] + params["b2"], 0.0)
    h = jnp.maximum(h @ params["w3"] + params["b3"], 0.0)
    return h @ params["w4"] + params["b4"]


if __name__ == "__main__":
    n_observations = 32
    n_actions = 8
    batch = 2

    key = jax.random.PRNGKey(0)
    key, kx = jax.random.split(key)
    x = jax.random.normal(kx, (batch, n_observations), jnp.float32)
    params = init_params(key, n_observations, n_actions)

    prepared, n_act = prepare_params(params)

    out = block_forward(x, prepared, n_actions=n_act)
    out = jax.block_until_ready(out)

    ref = reference_forward(x, params)
    assert out.shape == (batch, n_actions), out.shape
    # bf16 matmul inputs (f32 accumulation) -> loosened tolerance vs f32 reference.
    assert jnp.allclose(out, ref, atol=2e-2, rtol=2e-2), "mismatch vs reference"

    print("KERNEL_OK")
</pallas_src>

<mosaic_0001>
module attributes {stable_mosaic.version = 11 : i64} {
  func.func @_mlp_kernel(%arg0: i32, %arg1: memref<128x32xbf16, #tpu.memory_space<vmem>>, %arg2: memref<32x128xbf16, #tpu.memory_space<vmem>>, %arg3: memref<1x128xf32, #tpu.memory_space<vmem>>, %arg4: memref<128x256xbf16, #tpu.memory_space<vmem>>, %arg5: memref<1x256xf32, #tpu.memory_space<vmem>>, %arg6: memref<256x128xbf16, #tpu.memory_space<vmem>>, %arg7: memref<1x128xf32, #tpu.memory_space<vmem>>, %arg8: memref<128x128xbf16, #tpu.memory_space<vmem>>, %arg9: memref<1x128xf32, #tpu.memory_space<vmem>>, %arg10: memref<128x128xf32, #tpu.memory_space<vmem>>) attributes {dimension_semantics = [#tpu.dimension_semantics<parallel>], iteration_bounds = array<i64: 1>, scalar_prefetch = 0 : i64, scratch_operands = 0 : i64, tpu.core_type = #tpu.core_type<tc>, window_params = [{transform_indices = @transform_0, window_bounds = array<i64: 128, 32>}, {pipeline_mode = #tpu.pipeline_mode<synchronous>, transform_indices = @transform_1, window_bounds = array<i64: 32, 128>}, {pipeline_mode = #tpu.pipeline_mode<synchronous>, transform_indices = @transform_2, window_bounds = array<i64: 1, 128>}, {pipeline_mode = #tpu.pipeline_mode<synchronous>, transform_indices = @transform_3, window_bounds = array<i64: 128, 256>}, {pipeline_mode = #tpu.pipeline_mode<synchronous>, transform_indices = @transform_4, window_bounds = array<i64: 1, 256>}, {pipeline_mode = #tpu.pipeline_mode<synchronous>, transform_indices = @transform_5, window_bounds = array<i64: 256, 128>}, {pipeline_mode = #tpu.pipeline_mode<synchronous>, transform_indices = @transform_6, window_bounds = array<i64: 1, 128>}, {pipeline_mode = #tpu.pipeline_mode<synchronous>, transform_indices = @transform_7, window_bounds = array<i64: 128, 128>}, {pipeline_mode = #tpu.pipeline_mode<synchronous>, transform_indices = @transform_8, window_bounds = array<i64: 1, 128>}, {transform_indices = @transform_9, window_bounds = array<i64: 128, 128>}]} {
    %c0 = arith.constant 0 : index
    %c0_0 = arith.constant 0 : index
    %0 = vector.load %arg1[%c0, %c0_0] : memref<128x32xbf16, #tpu.memory_space<vmem>>, vector<128x32xbf16>
    %c0_1 = arith.constant 0 : index
    %c0_2 = arith.constant 0 : index
    %1 = vector.load %arg2[%c0_1, %c0_2] : memref<32x128xbf16, #tpu.memory_space<vmem>>, vector<32x128xbf16>
    %cst = arith.constant dense<0.000000e+00> : vector<128x128xf32>
    %2 = tpu.matmul %0, %1, %cst {dimension_numbers = #tpu.dot_dimension_numbers<[1], [0], [0], [1], [0, 0, 1, 1], [], []>} : vector<128x32xbf16>, vector<32x128xbf16>, vector<128x128xf32> -> vector<128x128xf32>
    %c0_3 = arith.constant 0 : index
    %c0_4 = arith.constant 0 : index
    %3 = vector.load %arg3[%c0_3, %c0_4] : memref<1x128xf32, #tpu.memory_space<vmem>>, vector<1x128xf32>
    %4 = vector.broadcast %3 : vector<1x128xf32> to vector<128x128xf32>
    %5 = arith.addf %2, %4 : vector<128x128xf32>
    %cst_5 = arith.constant 0.000000e+00 : f32
    %6 = vector.broadcast %cst_5 : f32 to vector<128x128xf32>
    %7 = arith.maximumf %5, %6 : vector<128x128xf32>
    %8 = arith.truncf %7 : vector<128x128xf32> to vector<128x128xbf16>
    %c0_6 = arith.constant 0 : index
    %c0_7 = arith.constant 0 : index
    %9 = vector.load %arg4[%c0_6, %c0_7] : memref<128x256xbf16, #tpu.memory_space<vmem>>, vector<128x256xbf16>
    %cst_8 = arith.constant dense<0.000000e+00> : vector<128x256xf32>
    %10 = tpu.matmul %8, %9, %cst_8 {dimension_numbers = #tpu.dot_dimension_numbers<[1], [0], [0], [1], [0, 0, 1, 1], [], []>} : vector<128x128xbf16>, vector<128x256xbf16>, vector<128x256xf32> -> vector<128x256xf32>
    %c0_9 = arith.constant 0 : index
    %c0_10 = arith.constant 0 : index
    %11 = vector.load %arg5[%c0_9, %c0_10] : memref<1x256xf32, #tpu.memory_space<vmem>>, vector<1x256xf32>
    %12 = vector.broadcast %11 : vector<1x256xf32> to vector<128x256xf32>
    %13 = arith.addf %10, %12 : vector<128x256xf32>
    %cst_11 = arith.constant 0.000000e+00 : f32
    %14 = vector.broadcast %cst_11 : f32 to vector<128x256xf32>
    %15 = arith.maximumf %13, %14 : vector<128x256xf32>
    %16 = arith.truncf %15 : vector<128x256xf32> to vector<128x256xbf16>
    %c0_12 = arith.constant 0 : index
    %c0_13 = arith.constant 0 : index
    %17 = vector.load %arg6[%c0_12, %c0_13] : memref<256x128xbf16, #tpu.memory_space<vmem>>, vector<256x128xbf16>
    %cst_14 = arith.constant dense<0.000000e+00> : vector<128x128xf32>
    %18 = tpu.matmul %16, %17, %cst_14 {dimension_numbers = #tpu.dot_dimension_numbers<[1], [0], [0], [1], [0, 0, 1, 1], [], []>} : vector<128x256xbf16>, vector<256x128xbf16>, vector<128x128xf32> -> vector<128x128xf32>
    %c0_15 = arith.constant 0 : index
    %c0_16 = arith.constant 0 : index
    %19 = vector.load %arg7[%c0_15, %c0_16] : memref<1x128xf32, #tpu.memory_space<vmem>>, vector<1x128xf32>
    %20 = vector.broadcast %19 : vector<1x128xf32> to vector<128x128xf32>
    %21 = arith.addf %18, %20 : vector<128x128xf32>
    %cst_17 = arith.constant 0.000000e+00 : f32
    %22 = vector.broadcast %cst_17 : f32 to vector<128x128xf32>
    %23 = arith.maximumf %21, %22 : vector<128x128xf32>
    %24 = arith.truncf %23 : vector<128x128xf32> to vector<128x128xbf16>
    %c0_18 = arith.constant 0 : index
    %c0_19 = arith.constant 0 : index
    %25 = vector.load %arg8[%c0_18, %c0_19] : memref<128x128xbf16, #tpu.memory_space<vmem>>, vector<128x128xbf16>
    %cst_20 = arith.constant dense<0.000000e+00> : vector<128x128xf32>
    %26 = tpu.matmul %24, %25, %cst_20 {dimension_numbers = #tpu.dot_dimension_numbers<[1], [0], [0], [1], [0, 0, 1, 1], [], []>} : vector<128x128xbf16>, vector<128x128xbf16>, vector<128x128xf32> -> vector<128x128xf32>
    %c0_21 = arith.constant 0 : index
    %c0_22 = arith.constant 0 : index
    %27 = vector.load %arg9[%c0_21, %c0_22] : memref<1x128xf32, #tpu.memory_space<vmem>>, vector<1x128xf32>
    %28 = vector.broadcast %27 : vector<1x128xf32> to vector<128x128xf32>
    %29 = arith.addf %26, %28 : vector<128x128xf32>
    %c0_23 = arith.constant 0 : index
    %c0_24 = arith.constant 0 : index
    %30 = vector.load %arg10[%c0_23, %c0_24] : memref<128x128xf32, #tpu.memory_space<vmem>>, vector<128x128xf32>
    tpu.vector_store %arg10[%c0_23, %c0_24], %29 {strides = array<i32>} : memref<128x128xf32, #tpu.memory_space<vmem>>, vector<128x128xf32>,
    return
  }
  func.func @transform_0(%arg0: i32) -> (i32, i32) {
    %c0_i32 = arith.constant 0 : i32
    %c0_i32_0 = arith.constant 0 : i32
    return %arg0, %c0_i32 : i32, i32
  }
  func.func @transform_1(%arg0: i32) -> (i32, i32) {
    %c0_i32 = arith.constant 0 : i32
    %c0_i32_0 = arith.constant 0 : i32
    %c0_i32_1 = arith.constant 0 : i32
    return %c0_i32, %c0_i32_0 : i32, i32
  }
  func.func @transform_2(%arg0: i32) -> (i32, i32) {
    %c0_i32 = arith.constant 0 : i32
    %c0_i32_0 = arith.constant 0 : i32
    %c0_i32_1 = arith.constant 0 : i32
    return %c0_i32, %c0_i32_0 : i32, i32
  }
  func.func @transform_3(%arg0: i32) -> (i32, i32) {
    %c0_i32 = arith.constant 0 : i32
    %c0_i32_0 = arith.constant 0 : i32
    %c0_i32_1 = arith.constant 0 : i32
    return %c0_i32, %c0_i32_0 : i32, i32
  }
  func.func @transform_4(%arg0: i32) -> (i32, i32) {
    %c0_i32 = arith.constant 0 : i32
    %c0_i32_0 = arith.constant 0 : i32
    %c0_i32_1 = arith.constant 0 : i32
    return %c0_i32, %c0_i32_0 : i32, i32
  }
  func.func @transform_5(%arg0: i32) -> (i32, i32) {
    %c0_i32 = arith.constant 0 : i32
    %c0_i32_0 = arith.constant 0 : i32
    %c0_i32_1 = arith.constant 0 : i32
    return %c0_i32, %c0_i32_0 : i32, i32
  }
  func.func @transform_6(%arg0: i32) -> (i32, i32) {
    %c0_i32 = arith.constant 0 : i32
    %c0_i32_0 = arith.constant 0 : i32
    %c0_i32_1 = arith.constant 0 : i32
    return %c0_i32, %c0_i32_0 : i32, i32
  }
  func.func @transform_7(%arg0: i32) -> (i32, i32) {
    %c0_i32 = arith.constant 0 : i32
    %c0_i32_0 = arith.constant 0 : i32
    %c0_i32_1 = arith.constant 0 : i32
    return %c0_i32, %c0_i32_0 : i32, i32
  }
  func.func @transform_8(%arg0: i32) -> (i32, i32) {
    %c0_i32 = arith.constant 0 : i32
    %c0_i32_0 = arith.constant 0 : i32
    %c0_i32_1 = arith.constant 0 : i32
    return %c0_i32, %c0_i32_0 : i32, i32
  }
  func.func @transform_9(%arg0: i32) -> (i32, i32) {
    %c0_i32 = arith.constant 0 : i32
    %c0_i32_0 = arith.constant 0 : i32
    return %arg0, %c0_i32 : i32, i32
  }
}

</mosaic_0001>

<bundles_post_ra>
// kernel: block_forward.1
= control target key start
LH: loop header
LB: loop body
LE: loop exit
PB: predicated region body
PF: predicated region fallthrough
CT: control target
= control target key end

     0   :  { %14 = vsyncpa [#allocation3], 0  ;;  %s1646_s0 = inlined_call_operand.vmem [shape: bf16[128,32], index: 0, kind: input, shape index: {}]   ;;  %s1647_s1 = inlined_call_operand.vmem [shape: bf16[32,128], index: 1, kind: input, shape index: {}]   ;;  %s1648_s2 = inlined_call_operand.vmem [shape: f32[1,128], index: 2, kind: input, shape index: {}]   ;;  %s1649_s3 = inlined_call_operand.hbm [shape: bf16[128,256], index: 3, kind: input, shape index: {}]   ;;  %s1650_s4 = inlined_call_operand.vmem [shape: f32[1,256], index: 4, kind: input, shape index: {}]   ;;  %s1651_s5 = inlined_call_operand.hbm [shape: bf16[256,128], index: 5, kind: input, shape index: {}]   ;;  %s1652_s6 = inlined_call_operand.hbm [shape: f32[1,128], index: 6, kind: input, shape index: {}]   ;;  %s1653_s7 = inlined_call_operand.vmem [shape: bf16[128,128], index: 7, kind: input, shape index: {}]   ;;  %s1654_s8 = inlined_call_operand.hbm [shape: f32[1,128], index: 8, kind: input, shape index: {}]   ;;  %s1655_s9 = inlined_call_operand.vmem [shape: f32[128,128], index: 9, kind: output, shape index: {}]  }
   0x1   :  { %15 = vsyncpa [#allocation5], 0 }
   0x2   :  { %16 = vsyncpa [#allocation8], 0  ;;  %s1397_s30 = smov [#allocation4]  }
   0x3   :  { %s42_s10 = sshll.u32 %s1397_s30, 4  ;;  %s43_s10 = int_to_ptr.vmem [resolvable:$true] %s42_s10 }
   0x4   :  { %s1319_s11 = scalar_lea.vmem %s43_s10, 2048  ;;  %p1324_p1 = scmp.lt.s32.totalorder %s43_s10, %s43_s10 }
   0x5   :  { %p1320_p0 = scmp.ne.s32.totalorder %s43_s10, %s1319_s11  ;;  %p1325_p2 = scmp.lt.s32.totalorder %s1319_s11, %s1319_s11 }
   0x7   :  { %p1326_p3 = por %p1325_p2, %p1324_p1 }
   0x9   :  { %p1327_p4 = pnand %p1326_p3, %p1320_p0 }
   0xb   :  { %1330 = shalt.err (!%p1327_p4)
}
   0xc   :  { %s1398_s12 = smov 64   ;;  %s1399_s13 = smov 4  }
   0xd   :  { %48 = dma.hbm_to_vmem [thread:$0]  %s1651_s5, 2048, %s43_s10, [#allocation5], %s1398_s12, %s1398_s12, %s1399_s13  }
   0xe   :  { %s1400_s16 = smov [#allocation2]  }
   0xf   :  { %s28_s17 = sshll.u32 %s1400_s16, 4  ;;  %s29_s17 = int_to_ptr.vmem [resolvable:$true] %s28_s17 }
  0x10   :  { %s1339_s18 = scalar_lea.vmem %s29_s17, 2048  ;;  %p1344_p6 = scmp.lt.s32.totalorder %s29_s17, %s29_s17 }
  0x11   :  { %p1340_p5 = scmp.ne.s32.totalorder %s29_s17, %s1339_s18  ;;  %p1345_p7 = scmp.lt.s32.totalorder %s1339_s18, %s1339_s18 }
  0x13   :  { %p1346_p8 = por %p1345_p7, %p1344_p6 }
  0x15   :  { %p1347_p9 = pnand %p1346_p8, %p1340_p5 }
  0x17   :  { %1350 = shalt.err (!%p1347_p9)
}
  0x18   :  { %s1401_s19 = smov 128   ;;  %s1402_s20 = smov 8  }
  0x19   :  { %34 = dma.hbm_to_vmem [thread:$0]  %s1649_s3, 2048, %s29_s17, [#allocation3], %s1401_s19, %s1401_s19, %s1402_s20  }
  0x1a   :  { %s1403_s23 = smov [#allocation6]   ;;  %s1404_s25 = smov [#allocation7]  }
  0x1b   :  { %s55_s24 = sshll.u32 %s1403_s23, 4  ;;  %s67_s5 = sshll.u32 %s1404_s25, 4  ;;  %s56_s24 = int_to_ptr.vmem [resolvable:$true] %s55_s24  ;;  %s68_s5 = int_to_ptr.vmem [resolvable:$true] %s67_s5 }
  0x1c   :  { %s1359_s26 = scalar_lea.vmem %s56_s24, 16  ;;  %s1363_s27 = scalar_lea.vmem %s56_s24, 32 }
  0x1d   :  { %p1360_p10 = scmp.ne.s32.totalorder %s56_s24, %s1359_s26  ;;  %p1364_p11 = scmp.lt.s32.totalorder %s56_s24, %s56_s24 }
  0x1e   :  { %p1365_p12 = scmp.lt.s32.totalorder %s1363_s27, %s1359_s26 }
  0x20   :  { %p1366_p13 = por %p1365_p12, %p1364_p11 }
  0x22   :  { %p1367_p0 = pnand %p1366_p13, %p1360_p10 }
  0x24   :  { %1370 = shalt.err (!%p1367_p0)
}
  0x25   :  { %58 = dma.hbm_to_vmem [thread:$0]  %s1652_s6, 16, %s56_s24, [#allocation5]  }
  0x26   :  { %s1379_s30 = scalar_lea.vmem %s68_s5, 16  ;;  %s1383_s3 = scalar_lea.vmem %s68_s5, 32 }
  0x27   :  { %p1380_p1 = scmp.ne.s32.totalorder %s68_s5, %s1379_s30  ;;  %p1384_p2 = scmp.lt.s32.totalorder %s68_s5, %s68_s5 }
  0x28   :  { %p1385_p3 = scmp.lt.s32.totalorder %s1383_s3, %s1379_s30 }
  0x2a   :  { %p1386_p4 = por %p1385_p3, %p1384_p2 }
  0x2c   :  { %p1387_p5 = pnand %p1386_p4, %p1380_p1 }
  0x2e   :  { %1390 = shalt.err (!%p1387_p5)
}
  0x2f   :  { %70 = dma.hbm_to_vmem [thread:$0]  %s1654_s8, 16, %s68_s5, [#allocation8]  }
  0x30   :  { %1391 = dma.done.wait [#allocation3], 2048  }
  0x31   :  { %1392 = vsyncadd [#allocation3], 4294965248 }
  0x32   :  { %1393 = dma.done.wait [#allocation5], 2064  }
  0x33   :  { %1394 = vsyncadd [#allocation5], 4294965232 }
  0x34   :  { %1395 = dma.done.wait [#allocation8], 16  }
  0x35   :  { %1396 = vsyncadd [#allocation8], 4294967280  ;;  %v1253_v0 = vld [vmem:[%s1647_s1 + $0x8] sm:$0xff]   ;;  %v1254_v1 = vld [vmem:[%s1647_s1] sm:$0xff]   ;;  %vm163_vm0 = vcmask 261120   ;;  %v1405_v26 = vmov 0  }
  0x36   :  { %1176 = vmatprep.subr.bf16.mxu0 %v1253_v0  ;;  %v1255_v2 = vld [vmem:[%s1646_s0] sm:$0xff]   ;;  %v1256_v3 = vld [vmem:[%s1646_s0 + $0x8] sm:$0xff]   ;;  %v1257_v4 = vld [vmem:[%s1646_s0 + $0x10] sm:$0xff]   ;;  %449 = vmatprep.mubr.bf16.mxu1 %v1405_v26 }
  0x37   :  { %1177 = vmatpush3.bf16.msra.mxu0 %v1253_v0  ;;  %1180 = vmatprep.mubr.msk.bf16.mxu0 %vm163_vm0, %v1255_v2  ;;  %v1263_v5 = vld [vmem:[#allocation2 + $0x74] ss:$8 sps:$4 sm:$0xff]   ;;  %v1265_v6 = vld [vmem:[#allocation2 + $0x70] ss:$8 sps:$4 sm:$0xff]   ;;  %v1266_v7 = vld [vmem:[#allocation2 + $0x64] ss:$8 sps:$4 sm:$0xff]  }
  0x38   :  { %1178 = vmatprep.subr.bf16.mxu0 %v1254_v1  ;;  %417 = vmatprep.subr.bf16.mxu1 %v1263_v5  ;;  %v1258_v8 = vld [vmem:[%s1646_s0 + $0x18] sm:$0xff]   ;;  %v1268_v9 = vld [vmem:[#allocation2 + $0x60] ss:$8 sps:$4 sm:$0xff]   ;;  %v1272_v13 = vld [vmem:[#allocation2 + $0x44] ss:$8 sps:$4 sm:$0xff]  }
  0x39   :  { %418 = vmatpush1.bf16.msra.mxu1 %v1265_v6  ;;  %v1269_v10 = vld [vmem:[#allocation2 + $0x54] ss:$8 sps:$4 sm:$0xff]   ;;  %v1259_v11 = vld [vmem:[%s1646_s0 + $0x20] sm:$0xff]   ;;  %v1271_v12 = vld [vmem:[#allocation2 + $0x50] ss:$8 sps:$4 sm:$0xff]  }
  0x3a   :  { %419 = vmatprep.subr.bf16.mxu1 %v1266_v7  ;;  %v1274_v14 = vld [vmem:[#allocation2 + $0x40] ss:$8 sps:$4 sm:$0xff]   ;;  %v1275_v16 = vld [vmem:[#allocation2 + $0x34] ss:$8 sps:$4 sm:$0xff]   ;;  %v1277_v18 = vld [vmem:[#allocation2 + $0x30] ss:$8 sps:$4 sm:$0xff]  }
  0x3b   :  { %1179 = vmatpush3.bf16.msra.mxu0 %v1254_v1  ;;  %v1260_v15 = vld [vmem:[%s1646_s0 + $0x28] sm:$0xff]   ;;  %v1261_v17 = vld [vmem:[%s1646_s0 + $0x30] sm:$0xff]   ;;  %v1262_v19 = vld [vmem:[%s1646_s0 + $0x38] sm:$0xff]  }
  0x3c   :  { %v1278_v20 = vld [vmem:[#allocation2 + $0x24] ss:$8 sps:$4 sm:$0xff]   ;;  %v1280_v21 = vld [vmem:[#allocation2 + $0x20] ss:$8 sps:$4 sm:$0xff]   ;;  %v1281_v22 = vld [vmem:[#allocation2 + $0x14] ss:$8 sps:$4 sm:$0xff]  }
  0x3d   :  { %420 = vmatpush1.bf16.msra.mxu1 %v1268_v9  ;;  %v1283_v23 = vld [vmem:[#allocation2 + $0x10] ss:$8 sps:$4 sm:$0xff]   ;;  %v1284_v24 = vld [vmem:[#allocation2 + $0x4] ss:$8 sps:$4 sm:$0xff]   ;;  %v1286_v25 = vld [vmem:[#allocation2] ss:$8 sps:$4 sm:$0xff]  }
  0x3e   :  { %1181 = vmatmul.mubr.msk.bf16.vlgmr.msra.gmra.mxu0 %vm163_vm0, %v1256_v3  ;;  %421 = vmatprep.subr.bf16.mxu1 %v1269_v10  ;;  %v1287_v27 = vld [vmem:[#allocation4 + $0x78] sm:$0xff]   ;;  %v1289_v29 = vld [vmem:[#allocation4 + $0x70] sm:$0xff]   ;;  %v1291_v31 = vld [vmem:[#allocation4 + $0x68] sm:$0xff]  }
  0x3f   :  { %1184 = vmatprep.mubr.msk.bf16.mxu0 %vm163_vm0, %v1257_v4  ;;  %v1288_v28 = vld [vmem:[#allocation4 + $0x38] sm:$0xff]   ;;  %1096 = vmatprep.subr.bf16.mxu0 %v1287_v27  ;;  %v1290_v30 = vld [vmem:[#allocation4 + $0x30] sm:$0xff]   ;;  %v1292_v32 = vld [vmem:[#allocation4 + $0x28] sm:$0xff]  }
  0x40   :  { %1097 = vmatpush3.bf16.msra.mxu0 %v1288_v28  ;;  %v1293_v33 = vld [vmem:[#allocation4 + $0x60] sm:$0xff]   ;;  %v1295_v35 = vld [vmem:[#allocation4 + $0x58] sm:$0xff]  }
  0x41   :  { %422 = vmatpush1.bf16.msra.mxu1 %v1271_v12  ;;  %1098 = vmatprep.subr.bf16.mxu0 %v1289_v29  ;;  %v1294_v34 = vld [vmem:[#allocation4 + $0x20] sm:$0xff]   ;;  %v1296_v36 = vld [vmem:[#allocation4 + $0x18] sm:$0xff]  }
  0x42   :  { %423 = vmatprep.subr.bf16.mxu1 %v1272_v13  ;;  %v1025_v39 = vld [vmem:[%s1648_s2] ss:$0 sm:$0xff] }
  0x44   :  { %1099 = vmatpush3.bf16.msra.mxu0 %v1290_v30 }
  0x45   :  { %424 = vmatpush1.bf16.msra.mxu1 %v1274_v14  ;;  %1100 = vmatprep.subr.bf16.mxu0 %v1291_v31  ;;  %v1297_v31 = vld [vmem:[#allocation4 + $0x50] sm:$0xff]  }
  0x46   :  { %1185 = vmatmul.mubr.msk.bf16.gmra.mxu0 %vm163_vm0, %v1258_v8  ;;  %425 = vmatprep.subr.bf16.mxu1 %v1275_v16 }
  0x47   :  { %1188 = vmatprep.mubr.msk.bf16.mxu0 %vm163_vm0, %v1259_v11 }
  0x48   :  { %1101 = vmatpush3.bf16.msra.mxu0 %v1292_v32  ;;  %v1298_v32 = vld [vmem:[#allocation4 + $0x10] sm:$0xff]  }
  0x49   :  { %426 = vmatpush1.bf16.msra.mxu1 %v1277_v18  ;;  %1102 = vmatprep.subr.bf16.mxu0 %v1293_v33  ;;  %v1299_v33 = vld [vmem:[#allocation4 + $0x48] sm:$0xff]  }
  0x4a   :  { %427 = vmatprep.subr.bf16.mxu1 %v1278_v20 }
  0x4c   :  { %1103 = vmatpush3.bf16.msra.mxu0 %v1294_v34  ;;  %v1300_v34 = vld [vmem:[#allocation4 + $0x8] sm:$0xff]  }
  0x4d   :  { %428 = vmatpush1.bf16.msra.mxu1 %v1280_v21  ;;  %1104 = vmatprep.subr.bf16.mxu0 %v1295_v35  ;;  %v1301_v35 = vld [vmem:[#allocation4 + $0x40] sm:$0xff]  }
  0x4e   :  { %1189 = vmatmul.mubr.msk.bf16.gmra.mxu0 %vm163_vm0, %v1260_v15  ;;  %429 = vmatprep.subr.bf16.mxu1 %v1281_v22 }
  0x4f   :  { %1192 = vmatprep.mubr.msk.bf16.mxu0 %vm163_vm0, %v1261_v17 }
  0x50   :  { %1105 = vmatpush3.bf16.msra.mxu0 %v1296_v36  ;;  %v1302_v36 = vld [vmem:[#allocation4] sm:$0xff]  }
  0x51   :  { %430 = vmatpush1.bf16.msra.mxu1 %v1283_v23  ;;  %1106 = vmatprep.subr.bf16.mxu0 %v1297_v31 }
  0x52   :  { %431 = vmatprep.subr.bf16.mxu1 %v1284_v24 }
  0x54   :  { %1107 = vmatpush3.bf16.msra.mxu0 %v1298_v32 }
  0x55   :  { %432 = vmatpush1.bf16.msra.mxu1 %v1286_v25  ;;  %1108 = vmatprep.subr.bf16.mxu0 %v1299_v33 }
  0x56   :  { %1193 = vmatmul.mubr.msk.bf16.gmra.mxu0 %vm163_vm0, %v1262_v19 }
  0x58   :  { %1109 = vmatpush3.bf16.msra.mxu0 %v1300_v34 }
  0x59   :  { %1110 = vmatprep.subr.bf16.mxu0 %v1301_v35 }
  0x5c   :  { %1111 = vmatpush3.bf16.msra.mxu0 %v1302_v36 }
  0xfe   :  { %v1182_v37 = vpop.f32.mrf.mxu0 }
  0xff   :  { %v231_v51 = vadd.f32 %v1182_v37, %v1025_v39  ;;  %v1304_v37 = vld [vmem:[%s1653_s7 + $0x30] sm:$0xff]  }
 0x100   :  { %v222_v38 = vpop.f32.mrf.mxu0 }
 0x101   :  { %v223_v41 = vadd.f32 %v1025_v39, %v222_v38  ;;  %v287_v54 = vmax.f32 %v231_v51, 0.0  ;;  %v1305_v38 = vld [vmem:[%s1653_s7 + $0x28] sm:$0xff]  }
 0x102   :  { %v1183_v40 = vpop.f32.mrf.mxu0 }
 0x103   :  { %v285_v45 = vmax.f32 %v223_v41, 0.0  ;;  %v234_v48 = vadd.f32 %v1183_v40, %v1025_v39 }
 0x104   :  { %v225_v42 = vpop.f32.mrf.mxu0 }
 0x105   :  { %v226_v43 = vadd.f32 %v1025_v39, %v225_v42  ;;  %v288_v52 = vmax.f32 %v234_v48, 0.0 }
 0x106   :  { %v1186_v44 = vpop.f32.mrf.mxu0 }
 0x107   :  { %v286_v46 = vmax.f32 %v226_v43, 0.0  ;;  %v302_v55 = vpack.c.bf16 %v288_v52, %v287_v54  ;;  %v247_v62 = vadd.f32 %v1186_v44, %v1025_v39  ;;  %v325_v43 = vld [vmem:[%s1650_s4] sm:$0x3] }
 0x108   :  { %v238_v47 = vpop.f32.mrf.mxu0 }
 0x109   :  { %v301_v49 = vpack.c.bf16 %v286_v46, %v285_v45  ;;  %v239_v56 = vadd.f32 %v1025_v39, %v238_v47  ;;  %v291_v2 = vmax.f32 %v247_v62, 0.0 }
 0x10a   :  { %v1187_v50 = vpop.f32.mrf.mxu0 }
 0x10b   :  { %450 = vmatmul.mubr.bf16.vlgmr.msra.gmra.mxu1 %v301_v49  ;;  %v289_v59 = vmax.f32 %v239_v56, 0.0  ;;  %v250_v63 = vadd.f32 %v1187_v50, %v1025_v39 }
 0x10c   :  { %459 = vmatprep.mubr.bf16.mxu1 %v1405_v26  ;;  %v241_v53 = vpop.f32.mrf.mxu0 }
 0x10d   :  { %v242_v57 = vadd.f32 %v1025_v39, %v241_v53  ;;  %v292_v3 = vmax.f32 %v250_v63, 0.0 }
 0x10e   :  { %v1190_v58 = vpop.f32.mrf.mxu0 }
 0x10f   :  { %v290_v60 = vmax.f32 %v242_v57, 0.0  ;;  %v304_v5 = vpack.c.bf16 %v292_v3, %v291_v2  ;;  %v263_v12 = vadd.f32 %v1190_v58, %v1025_v39 }
 0x110   :  { %v254_v61 = vpop.f32.mrf.mxu0 }
 0x111   :  { %v303_v0 = vpack.c.bf16 %v290_v60, %v289_v59  ;;  %v255_v6 = vadd.f32 %v1025_v39, %v254_v61  ;;  %v295_v16 = vmax.f32 %v263_v12, 0.0 }
 0x112   :  { %v1191_v1 = vpop.f32.mrf.mxu0 }
 0x113   :  { %460 = vmatmul.mubr.bf16.gmra.mxu1 %v302_v55  ;;  %v293_v9 = vmax.f32 %v255_v6, 0.0  ;;  %v266_v13 = vadd.f32 %v1191_v1, %v1025_v39 }
 0x114   :  { %469 = vmatprep.mubr.bf16.mxu1 %v1405_v26  ;;  %v257_v4 = vpop.f32.mrf.mxu0 }
 0x115   :  { %v258_v7 = vadd.f32 %v1025_v39, %v257_v4  ;;  %v296_v17 = vmax.f32 %v266_v13, 0.0 }
 0x116   :  { %v1194_v8 = vpop.f32.mrf.mxu0 }
 0x117   :  { %v294_v10 = vmax.f32 %v258_v7, 0.0  ;;  %v306_v19 = vpack.c.bf16 %v296_v17, %v295_v16  ;;  %v279_v24 = vadd.f32 %v1194_v8, %v1025_v39 }
 0x118   :  { %v270_v11 = vpop.f32.mrf.mxu0 }
 0x119   :  { %v305_v14 = vpack.c.bf16 %v294_v10, %v293_v9  ;;  %v271_v20 = vadd.f32 %v1025_v39, %v270_v11  ;;  %v299_v28 = vmax.f32 %v279_v24, 0.0 }
 0x11a   :  { %v1195_v15 = vpop.f32.mrf.mxu0 }
 0x11b   :  { %470 = vmatmul.mubr.bf16.gmra.mxu1 %v303_v0  ;;  %v297_v22 = vmax.f32 %v271_v20, 0.0  ;;  %v282_v25 = vadd.f32 %v1195_v15, %v1025_v39 }
 0x11c   :  { %479 = vmatprep.mubr.bf16.mxu1 %v1405_v26  ;;  %v273_v18 = vpop.f32.mrf.mxu0 }
 0x11d   :  { %v274_v21 = vadd.f32 %v1025_v39, %v273_v18  ;;  %v300_v29 = vmax.f32 %v282_v25, 0.0  ;;  %v327_v39 = vlaneseq }
 0x11f   :  { %v298_v23 = vmax.f32 %v274_v21, 0.0  ;;  %v308_v30 = vpack.c.bf16 %v300_v29, %v299_v28  ;;  %v328_v40 = vshrl.u32 %v327_v39, 7 }
 0x121   :  { %v307_v27 = vpack.c.bf16 %v298_v23, %v297_v22  ;;  %v333_v41 = vsub.s32 1, %v328_v40  ;;  %v329_v42 = vsub.s32 0, %v328_v40 }
 0x123   :  { %480 = vmatmul.mubr.bf16.gmra.mxu1 %v304_v5  ;;  %v1529_v45 = vrot.slane %v325_v43, %v333_v41  ;;  %v1531_v46 = vrot.slane %v325_v43, %v329_v42 }
 0x124   :  { %489 = vmatprep.mubr.bf16.mxu1 %v1405_v26 }
 0x12b   :  { %490 = vmatmul.mubr.bf16.gmra.mxu1 %v305_v14 }
 0x12c   :  { %499 = vmatprep.mubr.bf16.mxu1 %v1405_v26 }
 0x133   :  { %500 = vmatmul.mubr.bf16.gmra.mxu1 %v306_v19 }
 0x134   :  { %509 = vmatprep.mubr.bf16.mxu1 %v1405_v26 }
 0x13b   :  { %510 = vmatmul.mubr.bf16.gmra.mxu1 %v307_v27 }
 0x13c   :  { %519 = vmatprep.mubr.bf16.mxu1 %v1405_v26  ;;  %v1303_v26 = vld [vmem:[%s1653_s7 + $0x38] sm:$0xff]  }
 0x13d   :  { %1228 = vmatprep.subr.bf16.mxu1 %v1303_v26  ;;  %1196 = vmatprep.subr.bf16.mxu0 %v1303_v26 }
 0x13e   :  { %1236 = vmatpush3.bf16.msra.mxu1 %v1303_v26 }
 0x13f   :  { %1229 = vmatprep.subr.bf16.mxu1 %v1304_v37 }
 0x142   :  { %1237 = vmatpush3.bf16.msra.mxu1 %v1304_v37 }
 0x143   :  { %520 = vmatmul.mubr.bf16.gmra.mxu1 %v308_v30  ;;  %1230 = vmatprep.subr.bf16.mxu1 %v1305_v38 }
 0x146   :  { %1238 = vmatpush3.bf16.msra.mxu1 %v1305_v38 }
 0x1cb   :  { %v451_v44 = vpop.f32.mrf.mxu1 }
 0x1cc   :  { %v452_v51 = vadd.f32 %v451_v44, %v1531_v46 }
 0x1cd   :  { %v453_v47 = vpop.f32.mrf.mxu1 }
 0x1ce   :  { %v454_v49 = vadd.f32 %v453_v47, %v1529_v45  ;;  %v530_v58 = vmax.f32 %v452_v51, 0.0 }
 0x1cf   :  { %v455_v48 = vpop.f32.mrf.mxu1 }
 0x1d0   :  { %v456_v50 = vadd.f32 %v455_v48, %v1531_v46  ;;  %v531_v56 = vmax.f32 %v454_v49, 0.0 }
 0x1d1   :  { %v457_v52 = vpop.f32.mrf.mxu1 }
 0x1d2   :  { %v458_v53 = vadd.f32 %v457_v52, %v1529_v45  ;;  %v532_v54 = vmax.f32 %v456_v50, 0.0 }
 0x1d3   :  { %v461_v55 = vpop.f32.mrf.mxu1 }
 0x1d4   :  { %v533_v57 = vmax.f32 %v458_v53, 0.0  ;;  %v562_v61 = vpack.c.bf16 %v532_v54, %v530_v58  ;;  %v462_v1 = vadd.f32 %v461_v55, %v1531_v46 }
 0x1d5   :  { %v463_v59 = vpop.f32.mrf.mxu1 }
 0x1d6   :  { %v563_v60 = vpack.c.bf16 %v533_v57, %v531_v56  ;;  %v464_v63 = vadd.f32 %v463_v59, %v1529_v45  ;;  %v534_v8 = vmax.f32 %v462_v1, 0.0 }
 0x1d7   :  { %v465_v62 = vpop.f32.mrf.mxu1 }
 0x1d8   :  { %v466_v0 = vadd.f32 %v465_v62, %v1531_v46  ;;  %745 = vmatprep.mubr.bf16.mxu0 %v563_v60  ;;  %v535_v6 = vmax.f32 %v464_v63, 0.0 }
 0x1d9   :  { %v467_v2 = vpop.f32.mrf.mxu1  ;;  %746 = vmatmul.mubr.bf16.vlgmr.msra.gmra.mxu0 %v562_v61 }
 0x1da   :  { %v468_v3 = vadd.f32 %v467_v2, %v1529_v45  ;;  %1197 = vmatpush3.bf16.msra.mxu0 %v1303_v26  ;;  %v536_v4 = vmax.f32 %v466_v0, 0.0 }
 0x1db   :  { %v471_v5 = vpop.f32.mrf.mxu1  ;;  %1198 = vmatprep.subr.bf16.mxu0 %v1304_v37 }
 0x1dc   :  { %v537_v7 = vmax.f32 %v468_v3, 0.0  ;;  %v564_v11 = vpack.c.bf16 %v536_v4, %v534_v8  ;;  %v472_v15 = vadd.f32 %v471_v5, %v1531_v46 }
 0x1dd   :  { %v473_v9 = vpop.f32.mrf.mxu1 }
 0x1de   :  { %v565_v10 = vpack.c.bf16 %v537_v7, %v535_v6  ;;  %1199 = vmatpush3.bf16.msra.mxu0 %v1304_v37  ;;  %v474_v13 = vadd.f32 %v473_v9, %v1529_v45  ;;  %v538_v22 = vmax.f32 %v472_v15, 0.0 }
 0x1df   :  { %v475_v12 = vpop.f32.mrf.mxu1  ;;  %1200 = vmatprep.subr.bf16.mxu0 %v1305_v38 }
 0x1e0   :  { %v476_v14 = vadd.f32 %v475_v12, %v1531_v46  ;;  %753 = vmatprep.mubr.bf16.mxu0 %v565_v10  ;;  %v539_v20 = vmax.f32 %v474_v13, 0.0 }
 0x1e1   :  { %v477_v16 = vpop.f32.mrf.mxu1  ;;  %754 = vmatmul.mubr.bf16.gmra.mxu0 %v564_v11 }
 0x1e2   :  { %v478_v17 = vadd.f32 %v477_v16, %v1529_v45  ;;  %1201 = vmatpush3.bf16.msra.mxu0 %v1305_v38  ;;  %v540_v18 = vmax.f32 %v476_v14, 0.0 }
 0x1e3   :  { %v481_v19 = vpop.f32.mrf.mxu1 }
 0x1e4   :  { %v541_v21 = vmax.f32 %v478_v17, 0.0  ;;  %v566_v25 = vpack.c.bf16 %v540_v18, %v538_v22  ;;  %v482_v30 = vadd.f32 %v481_v19, %v1531_v46 }
 0x1e5   :  { %v483_v23 = vpop.f32.mrf.mxu1 }
 0x1e6   :  { %v567_v24 = vpack.c.bf16 %v541_v21, %v539_v20  ;;  %v484_v28 = vadd.f32 %v483_v23, %v1529_v45  ;;  %v542_v26 = vmax.f32 %v482_v30, 0.0 }
 0x1e7   :  { %v485_v27 = vpop.f32.mrf.mxu1 }
 0x1e8   :  { %v486_v29 = vadd.f32 %v485_v27, %v1531_v46  ;;  %761 = vmatprep.mubr.bf16.mxu0 %v567_v24  ;;  %v543_v35 = vmax.f32 %v484_v28, 0.0 }
 0x1e9   :  { %v487_v31 = vpop.f32.mrf.mxu1  ;;  %762 = vmatmul.mubr.bf16.gmra.mxu0 %v566_v25 }
 0x1ea   :  { %v488_v32 = vadd.f32 %v487_v31, %v1529_v45  ;;  %v544_v33 = vmax.f32 %v486_v29, 0.0 }
 0x1eb   :  { %v491_v34 = vpop.f32.mrf.mxu1 }
 0x1ec   :  { %v545_v36 = vmax.f32 %v488_v32, 0.0  ;;  %v568_v39 = vpack.c.bf16 %v544_v33, %v542_v26  ;;  %v492_v43 = vadd.f32 %v491_v34, %v1531_v46  ;;  %v1306_v33 = vld [vmem:[%s1653_s7 + $0x20] sm:$0xff]   ;;  %v1309_v34 = vld [vmem:[%s1653_s7 + $0x8] sm:$0xff]  }
 0x1ed   :  { %v493_v37 = vpop.f32.mrf.mxu1  ;;  %1202 = vmatprep.subr.bf16.mxu0 %v1306_v33  ;;  %1231 = vmatprep.subr.bf16.mxu1 %v1306_v33 }
 0x1ee   :  { %v569_v38 = vpack.c.bf16 %v545_v36, %v543_v35  ;;  %v494_v41 = vadd.f32 %v493_v37, %v1529_v45  ;;  %v546_v52 = vmax.f32 %v492_v43, 0.0  ;;  %1203 = vmatpush3.bf16.msra.mxu0 %v1306_v33  ;;  %1239 = vmatpush3.bf16.msra.mxu1 %v1306_v33  ;;  %v1310_v35 = vld [vmem:[%s1653_s7] sm:$0xff]  }
 0x1ef   :  { %v495_v40 = vpop.f32.mrf.mxu1 }
 0x1f0   :  { %v496_v42 = vadd.f32 %v495_v40, %v1531_v46  ;;  %769 = vmatprep.mubr.bf16.mxu0 %v569_v38  ;;  %v547_v50 = vmax.f32 %v494_v41, 0.0  ;;  %v1580_v38 = vld [vmem:[#allocation6] ss:$0 sm:$0xff] }
 0x1f1   :  { %v497_v44 = vpop.f32.mrf.mxu1  ;;  %770 = vmatmul.mubr.bf16.gmra.mxu0 %v568_v39 }
 0x1f2   :  { %v498_v47 = vadd.f32 %v497_v44, %v1529_v45  ;;  %v548_v48 = vmax.f32 %v496_v42, 0.0 }
 0x1f3   :  { %v501_v49 = vpop.f32.mrf.mxu1 }
 0x1f4   :  { %v549_v51 = vmax.f32 %v498_v47, 0.0  ;;  %v570_v55 = vpack.c.bf16 %v548_v48, %v546_v52  ;;  %v502_v59 = vadd.f32 %v501_v49, %v1531_v46 }
 0x1f5   :  { %v503_v53 = vpop.f32.mrf.mxu1 }
 0x1f6   :  { %v571_v54 = vpack.c.bf16 %v549_v51, %v547_v50  ;;  %v504_v57 = vadd.f32 %v503_v53, %v1529_v45  ;;  %v550_v2 = vmax.f32 %v502_v59, 0.0 }
 0x1f7   :  { %v505_v56 = vpop.f32.mrf.mxu1 }
 0x1f8   :  { %v506_v58 = vadd.f32 %v505_v56, %v1531_v46  ;;  %777 = vmatprep.mubr.bf16.mxu0 %v571_v54  ;;  %v551_v0 = vmax.f32 %v504_v57, 0.0 }
 0x1f9   :  { %v507_v60 = vpop.f32.mrf.mxu1  ;;  %778 = vmatmul.mubr.bf16.gmra.mxu0 %v570_v55 }
 0x1fa   :  { %v508_v61 = vadd.f32 %v507_v60, %v1529_v45  ;;  %v552_v62 = vmax.f32 %v506_v58, 0.0 }
 0x1fb   :  { %v511_v63 = vpop.f32.mrf.mxu1 }
 0x1fc   :  { %v553_v1 = vmax.f32 %v508_v61, 0.0  ;;  %v572_v5 = vpack.c.bf16 %v552_v62, %v550_v2  ;;  %v512_v9 = vadd.f32 %v511_v63, %v1531_v46 }
 0x1fd   :  { %v513_v3 = vpop.f32.mrf.mxu1 }
 0x1fe   :  { %v573_v4 = vpack.c.bf16 %v553_v1, %v551_v0  ;;  %v514_v7 = vadd.f32 %v513_v3, %v1529_v45  ;;  %v554_v16 = vmax.f32 %v512_v9, 0.0 }
 0x1ff   :  { %v515_v6 = vpop.f32.mrf.mxu1 }
 0x200   :  { %v516_v8 = vadd.f32 %v515_v6, %v1531_v46  ;;  %785 = vmatprep.mubr.bf16.mxu0 %v573_v4  ;;  %v555_v14 = vmax.f32 %v514_v7, 0.0 }
 0x201   :  { %v517_v10 = vpop.f32.mrf.mxu1  ;;  %786 = vmatmul.mubr.bf16.gmra.mxu0 %v572_v5 }
 0x202   :  { %v518_v11 = vadd.f32 %v517_v10, %v1529_v45  ;;  %v556_v12 = vmax.f32 %v516_v8, 0.0 }
 0x203   :  { %v521_v13 = vpop.f32.mrf.mxu1 }
 0x204   :  { %v557_v15 = vmax.f32 %v518_v11, 0.0  ;;  %v574_v19 = vpack.c.bf16 %v556_v12, %v554_v16  ;;  %v522_v23 = vadd.f32 %v521_v13, %v1531_v46 }
 0x205   :  { %v523_v17 = vpop.f32.mrf.mxu1 }
 0x206   :  { %v575_v18 = vpack.c.bf16 %v557_v15, %v555_v14  ;;  %v524_v21 = vadd.f32 %v523_v17, %v1529_v45  ;;  %v558_v30 = vmax.f32 %v522_v23, 0.0 }
 0x207   :  { %v525_v20 = vpop.f32.mrf.mxu1 }
 0x208   :  { %v526_v22 = vadd.f32 %v525_v20, %v1531_v46  ;;  %793 = vmatprep.mubr.bf16.mxu0 %v575_v18  ;;  %v559_v28 = vmax.f32 %v524_v21, 0.0  ;;  %v1308_v46 = vld [vmem:[%s1653_s7 + $0x10] sm:$0xff]  }
 0x209   :  { %v527_v24 = vpop.f32.mrf.mxu1  ;;  %794 = vmatmul.mubr.bf16.gmra.mxu0 %v574_v19 }
 0x20a   :  { %v528_v25 = vadd.f32 %v527_v24, %v1529_v45  ;;  %v560_v27 = vmax.f32 %v526_v22, 0.0  ;;  %v1307_v45 = vld [vmem:[%s1653_s7 + $0x18] sm:$0xff]  }
 0x20b   :  { %1204 = vmatprep.subr.bf16.mxu0 %v1307_v45  ;;  %1232 = vmatprep.subr.bf16.mxu1 %v1307_v45 }
 0x20c   :  { %v561_v29 = vmax.f32 %v528_v25, 0.0  ;;  %v576_v32 = vpack.c.bf16 %v560_v27, %v558_v30  ;;  %1205 = vmatpush3.bf16.msra.mxu0 %v1307_v45  ;;  %1240 = vmatpush3.bf16.msra.mxu1 %v1307_v45 }
 0x20d   :  { %1206 = vmatprep.subr.bf16.mxu0 %v1308_v46  ;;  %1233 = vmatprep.subr.bf16.mxu1 %v1308_v46 }
 0x20e   :  { %v577_v31 = vpack.c.bf16 %v561_v29, %v559_v28 }
 0x210   :  { %801 = vmatprep.mubr.bf16.mxu0 %v577_v31  ;;  %1207 = vmatpush3.bf16.msra.mxu0 %v1308_v46 }
 0x211   :  { %802 = vmatmul.mubr.bf16.gmra.mxu0 %v576_v32  ;;  %1241 = vmatpush3.bf16.msra.mxu1 %v1308_v46 }
 0x212   :  { %1208 = vmatprep.subr.bf16.mxu0 %v1309_v34  ;;  %1234 = vmatprep.subr.bf16.mxu1 %v1309_v34 }
 0x214   :  { %1209 = vmatpush3.bf16.msra.mxu0 %v1309_v34 }
 0x215   :  { %1242 = vmatpush3.bf16.msra.mxu1 %v1309_v34  ;;  %1210 = vmatprep.subr.bf16.mxu0 %v1310_v35 }
 0x216   :  { %1235 = vmatprep.subr.bf16.mxu1 %v1310_v35 }
 0x218   :  { %1211 = vmatpush3.bf16.msra.mxu0 %v1310_v35 }
 0x219   :  { %1243 = vmatpush3.bf16.msra.mxu1 %v1310_v35 }
 0x299   :  { %v1112_v36 = vpop.f32.mrf.mxu0 }
 0x29b   :  { %v1113_v26 = vpop.f32.mrf.mxu0 }
 0x29c   :  { %v1114_v37 = vadd.f32 %v1113_v26, %v1112_v36 }
 0x29d   :  { %v1115_v39 = vpop.f32.mrf.mxu0 }
 0x29e   :  { %v748_v41 = vadd.f32 %v1114_v37, %v1580_v38 }
 0x29f   :  { %v1116_v40 = vpop.f32.mrf.mxu0 }
 0x2a0   :  { %v1117_v42 = vadd.f32 %v1116_v40, %v1115_v39  ;;  %v810_v48 = vmax.f32 %v748_v41, 0.0 }
 0x2a1   :  { %v1118_v43 = vpop.f32.mrf.mxu0 }
 0x2a2   :  { %v751_v44 = vadd.f32 %v1117_v42, %v1580_v38 }
 0x2a3   :  { %v1119_v47 = vpop.f32.mrf.mxu0 }
 0x2a4   :  { %v811_v49 = vmax.f32 %v751_v44, 0.0  ;;  %v1120_v50 = vadd.f32 %v1119_v47, %v1118_v43 }
 0x2a5   :  { %v1121_v51 = vpop.f32.mrf.mxu0 }
 0x2a6   :  { %v826_v52 = vpack.c.bf16 %v811_v49, %v810_v48  ;;  %v756_v54 = vadd.f32 %v1120_v50, %v1580_v38 }
 0x2a7   :  { %v1122_v53 = vpop.f32.mrf.mxu0 }
 0x2a8   :  { %v1123_v55 = vadd.f32 %v1122_v53, %v1121_v51  ;;  %1212 = vmatprep.mubr.bf16.mxu0 %v826_v52  ;;  %v812_v59 = vmax.f32 %v756_v54, 0.0 }
 0x2a9   :  { %v1124_v56 = vpop.f32.mrf.mxu0 }
 0x2aa   :  { %v759_v57 = vadd.f32 %v1123_v55, %v1580_v38 }
 0x2ab   :  { %v1125_v58 = vpop.f32.mrf.mxu0 }
 0x2ac   :  { %v813_v60 = vmax.f32 %v759_v57, 0.0  ;;  %v1126_v61 = vadd.f32 %v1125_v58, %v1124_v56 }
 0x2ad   :  { %v1127_v62 = vpop.f32.mrf.mxu0 }
 0x2ae   :  { %v827_v63 = vpack.c.bf16 %v813_v60, %v812_v59  ;;  %v764_v1 = vadd.f32 %v1126_v61, %v1580_v38 }
 0x2af   :  { %v1128_v0 = vpop.f32.mrf.mxu0 }
 0x2b0   :  { %v1129_v2 = vadd.f32 %v1128_v0, %v1127_v62  ;;  %1213 = vmatmul.mubr.bf16.vlgmr.msra.gmra.mxu0 %v827_v63  ;;  %v814_v6 = vmax.f32 %v764_v1, 0.0  ;;  %v1077_v63 = vld [vmem:[#allocation7] ss:$0 sm:$0xff] }
 0x2b1   :  { %v1130_v3 = vpop.f32.mrf.mxu0 }
 0x2b2   :  { %v767_v4 = vadd.f32 %v1129_v2, %v1580_v38 }
 0x2b3   :  { %v1131_v5 = vpop.f32.mrf.mxu0 }
 0x2b4   :  { %v815_v7 = vmax.f32 %v767_v4, 0.0  ;;  %v1132_v8 = vadd.f32 %v1131_v5, %v1130_v3 }
 0x2b5   :  { %v1133_v9 = vpop.f32.mrf.mxu0 }
 0x2b6   :  { %v828_v10 = vpack.c.bf16 %v815_v7, %v814_v6  ;;  %v772_v12 = vadd.f32 %v1132_v8, %v1580_v38 }
 0x2b7   :  { %v1134_v11 = vpop.f32.mrf.mxu0 }
 0x2b8   :  { %v1135_v13 = vadd.f32 %v1134_v11, %v1133_v9  ;;  %1216 = vmatprep.mubr.bf16.mxu1 %v828_v10  ;;  %v816_v17 = vmax.f32 %v772_v12, 0.0 }
 0x2b9   :  { %v1136_v14 = vpop.f32.mrf.mxu0 }
 0x2ba   :  { %v775_v15 = vadd.f32 %v1135_v13, %v1580_v38 }
 0x2bb   :  { %v1137_v16 = vpop.f32.mrf.mxu0 }
 0x2bc   :  { %v817_v18 = vmax.f32 %v775_v15, 0.0  ;;  %v1138_v19 = vadd.f32 %v1137_v16, %v1136_v14 }
 0x2bd   :  { %v1139_v20 = vpop.f32.mrf.mxu0 }
 0x2be   :  { %v829_v21 = vpack.c.bf16 %v817_v18, %v816_v17  ;;  %v780_v23 = vadd.f32 %v1138_v19, %v1580_v38 }
 0x2bf   :  { %v1140_v22 = vpop.f32.mrf.mxu0 }
 0x2c0   :  { %v1141_v24 = vadd.f32 %v1140_v22, %v1139_v20  ;;  %1217 = vmatmul.mubr.bf16.vlgmr.msra.gmra.mxu1 %v829_v21  ;;  %v818_v29 = vmax.f32 %v780_v23, 0.0 }
 0x2c1   :  { %v1142_v25 = vpop.f32.mrf.mxu0 }
 0x2c2   :  { %v783_v27 = vadd.f32 %v1141_v24, %v1580_v38 }
 0x2c3   :  { %v1143_v28 = vpop.f32.mrf.mxu0 }
 0x2c4   :  { %v819_v30 = vmax.f32 %v783_v27, 0.0  ;;  %v1144_v31 = vadd.f32 %v1143_v28, %v1142_v25 }
 0x2c5   :  { %v1145_v32 = vpop.f32.mrf.mxu0 }
 0x2c6   :  { %v830_v33 = vpack.c.bf16 %v819_v30, %v818_v29  ;;  %v788_v46 = vadd.f32 %v1144_v31, %v1580_v38 }
 0x2c7   :  { %v1146_v45 = vpop.f32.mrf.mxu0 }
 0x2c8   :  { %v1147_v34 = vadd.f32 %v1146_v45, %v1145_v32  ;;  %1220 = vmatprep.mubr.bf16.mxu1 %v830_v33  ;;  %v820_v37 = vmax.f32 %v788_v46, 0.0 }
 0x2c9   :  { %v1148_v35 = vpop.f32.mrf.mxu0 }
 0x2ca   :  { %v791_v36 = vadd.f32 %v1147_v34, %v1580_v38 }
 0x2cb   :  { %v1149_v26 = vpop.f32.mrf.mxu0 }
 0x2cc   :  { %v821_v39 = vmax.f32 %v791_v36, 0.0  ;;  %v1150_v40 = vadd.f32 %v1149_v26, %v1148_v35 }
 0x2cd   :  { %v1151_v41 = vpop.f32.mrf.mxu0 }
 0x2ce   :  { %v831_v42 = vpack.c.bf16 %v821_v39, %v820_v37  ;;  %v796_v44 = vadd.f32 %v1150_v40, %v1580_v38 }
 0x2cf   :  { %v1152_v43 = vpop.f32.mrf.mxu0 }
 0x2d0   :  { %v1153_v47 = vadd.f32 %v1152_v43, %v1151_v41  ;;  %1221 = vmatmul.mubr.bf16.gmra.mxu1 %v831_v42  ;;  %v822_v51 = vmax.f32 %v796_v44, 0.0 }
 0x2d1   :  { %v1154_v48 = vpop.f32.mrf.mxu0 }
 0x2d2   :  { %v799_v49 = vadd.f32 %v1153_v47, %v1580_v38 }
 0x2d3   :  { %v1155_v50 = vpop.f32.mrf.mxu0 }
 0x2d4   :  { %v823_v52 = vmax.f32 %v799_v49, 0.0  ;;  %v1156_v53 = vadd.f32 %v1155_v50, %v1154_v48 }
 0x2d5   :  { %v1157_v54 = vpop.f32.mrf.mxu0 }
 0x2d6   :  { %v832_v55 = vpack.c.bf16 %v823_v52, %v822_v51  ;;  %v804_v57 = vadd.f32 %v1156_v53, %v1580_v38 }
 0x2d7   :  { %v1158_v56 = vpop.f32.mrf.mxu0 }
 0x2d8   :  { %v1159_v58 = vadd.f32 %v1158_v56, %v1157_v54  ;;  %1224 = vmatprep.mubr.bf16.mxu1 %v832_v55  ;;  %v824_v60 = vmax.f32 %v804_v57, 0.0 }
 0x2da   :  { %v807_v59 = vadd.f32 %v1159_v58, %v1580_v38 }
 0x2dc   :  { %v825_v61 = vmax.f32 %v807_v59, 0.0 }
 0x2de   :  { %v833_v62 = vpack.c.bf16 %v825_v61, %v824_v60 }
 0x2e0   :  { %1225 = vmatmul.mubr.bf16.gmra.mxu1 %v833_v62 }
 0x370   :  { %v1214_v0 = vpop.f32.mrf.mxu0 }
 0x371   :  { %v948_v1 = vadd.f32 %v1214_v0, %v1077_v63 }
 0x372   :  { %v939_v2 = vpop.f32.mrf.mxu0 }
 0x373   :  { %1004 = vst [vmem:[%s1655_s9 + $0x10] sm:$0xff] %v948_v1  ;;  %v940_v3 = vadd.f32 %v1077_v63, %v939_v2 }
 0x374   :  { %v1215_v4 = vpop.f32.mrf.mxu0 }
 0x375   :  { %1002 = vst [vmem:[%s1655_s9] sm:$0xff] %v940_v3  ;;  %v951_v5 = vadd.f32 %v1215_v4, %v1077_v63 }
 0x376   :  { %v942_v38 = vpop.f32.mrf.mxu0 }
 0x377   :  { %1005 = vst [vmem:[%s1655_s9 + $0x18] sm:$0xff] %v951_v5  ;;  %v943_v6 = vadd.f32 %v1077_v63, %v942_v38 }
 0x379   :  { %1003 = vst [vmem:[%s1655_s9 + $0x8] sm:$0xff] %v943_v6 }
 0x380   :  { %v1218_v7 = vpop.f32.mrf.mxu1 }
 0x381   :  { %v964_v8 = vadd.f32 %v1218_v7, %v1077_v63 }
 0x382   :  { %v955_v9 = vpop.f32.mrf.mxu1 }
 0x383   :  { %1008 = vst [vmem:[%s1655_s9 + $0x30] sm:$0xff] %v964_v8  ;;  %v956_v10 = vadd.f32 %v1077_v63, %v955_v9 }
 0x384   :  { %v1219_v11 = vpop.f32.mrf.mxu1 }
 0x385   :  { %1006 = vst [vmem:[%s1655_s9 + $0x20] sm:$0xff] %v956_v10  ;;  %v967_v12 = vadd.f32 %v1219_v11, %v1077_v63 }
 0x386   :  { %v958_v13 = vpop.f32.mrf.mxu1 }
 0x387   :  { %1009 = vst [vmem:[%s1655_s9 + $0x38] sm:$0xff] %v967_v12  ;;  %v959_v14 = vadd.f32 %v1077_v63, %v958_v13 }
 0x389   :  { %1007 = vst [vmem:[%s1655_s9 + $0x28] sm:$0xff] %v959_v14 }
 0x390   :  { %v1222_v15 = vpop.f32.mrf.mxu1 }
 0x391   :  { %v980_v16 = vadd.f32 %v1222_v15, %v1077_v63 }
 0x392   :  { %v971_v17 = vpop.f32.mrf.mxu1 }
 0x393   :  { %1012 = vst [vmem:[%s1655_s9 + $0x50] sm:$0xff] %v980_v16  ;;  %v972_v18 = vadd.f32 %v1077_v63, %v971_v17 }
 0x394   :  { %v1223_v19 = vpop.f32.mrf.mxu1 }
 0x395   :  { %1010 = vst [vmem:[%s1655_s9 + $0x40] sm:$0xff] %v972_v18  ;;  %v983_v20 = vadd.f32 %v1223_v19, %v1077_v63 }
 0x396   :  { %v974_v21 = vpop.f32.mrf.mxu1 }
 0x397   :  { %1013 = vst [vmem:[%s1655_s9 + $0x58] sm:$0xff] %v983_v20  ;;  %v975_v22 = vadd.f32 %v1077_v63, %v974_v21 }
 0x399   :  { %1011 = vst [vmem:[%s1655_s9 + $0x48] sm:$0xff] %v975_v22 }
 0x3a0   :  { %v1226_v23 = vpop.f32.mrf.mxu1 }
 0x3a1   :  { %v996_v24 = vadd.f32 %v1226_v23, %v1077_v63 }
 0x3a2   :  { %v987_v25 = vpop.f32.mrf.mxu1 }
 0x3a3   :  { %1016 = vst [vmem:[%s1655_s9 + $0x70] sm:$0xff] %v996_v24  ;;  %v988_v27 = vadd.f32 %v1077_v63, %v987_v25 }
 0x3a4   :  { %v1227_v28 = vpop.f32.mrf.mxu1 }
 0x3a5   :  { %1014 = vst [vmem:[%s1655_s9 + $0x60] sm:$0xff] %v988_v27  ;;  %v999_v29 = vadd.f32 %v1227_v28, %v1077_v63 }
 0x3a6   :  { %v990_v30 = vpop.f32.mrf.mxu1 }
 0x3a7   :  { %1017 = vst [vmem:[%s1655_s9 + $0x78] sm:$0xff] %v999_v29  ;;  %v991_v31 = vadd.f32 %v1077_v63, %v990_v30 }
 0x3a9   :  { %1015 = vst [vmem:[%s1655_s9 + $0x68] sm:$0xff] %v991_v31 }
 0x3aa   :  { %1022 = vsyncpa [#allocation3], 1 }
 0x3ab   :  { %1023 = vsyncpa [#allocation5], 1 }
 0x3ac   :  { %1024 = vsyncpa [#allocation8], 1 }

</bundles_post_ra>
